<compile_context>
chip_gen: v7x
topology: tpu7x:2x2x1
jax: 0.10.0
libtpu: 0.0.40
codegen_flags: <defaults>
</compile_context>

<pallas_src>
import functools
import math

import jax
import jax.numpy as jnp
from jax import lax
from jax.experimental import pallas as pl
from jax.experimental.pallas import tpu as pltpu

_LANE = 128


def _round_up(x, m):
    return (x + m - 1) // m * m


def _ntxent_kernel(qi_ref, qj_ref, ki_ref, kj_ref, out_ref,
                   acc_i_ref, acc_j_ref, *, n_valid, n_pad, tau, tm):
    r = pl.program_id(0)
    c = pl.program_id(1)

    @pl.when(c == 0)
    def _init():
        acc_i_ref[...] = jnp.zeros_like(acc_i_ref)
        acc_j_ref[...] = jnp.zeros_like(acc_j_ref)

    # Row tiles stay resident along the column axis; column tiles are streamed.
    # Inputs are pre-normalized and pre-scaled by 1/sqrt(tau) in the wrapper,
    # so every dot product below is already sim/tau.
    qi = qi_ref[...]          # [TM, D]
    qj = qj_ref[...]
    ki = ki_ref[...]          # [TN, D]
    kj = kj_ref[...]

    # "NT" contraction (contract the feature dim of both operands, no transpose).
    dn = (((1,), (1,)), ((), ()))
    s_ii = lax.dot_general(qi, ki, dn, preferred_element_type=jnp.float32)
    s_ij = lax.dot_general(qi, kj, dn, preferred_element_type=jnp.float32)
    acc_i_ref[...] += jnp.sum(jnp.exp(s_ii) + jnp.exp(s_ij), axis=-1,
                              keepdims=True)                         # [TM, 1]

    s_ji = lax.dot_general(qj, ki, dn, preferred_element_type=jnp.float32)
    s_jj = lax.dot_general(qj, kj, dn, preferred_element_type=jnp.float32)
    acc_j_ref[...] += jnp.sum(jnp.exp(s_ji) + jnp.exp(s_jj), axis=-1,
                              keepdims=True)                         # [TM, 1]

    @pl.when(c == pl.num_programs(1) - 1)
    def _finalize():
        # <qi, qj> == sim_pos / tau (1/sqrt(tau) folded into each operand).
        pos = jnp.sum(qi.astype(jnp.float32) * qj.astype(jnp.float32),
                      axis=1, keepdims=True)                         # [TM, 1]
        # Zero padded columns contribute exactly exp(0)=1 per branch; the
        # diagonal contributes exp(1/tau) (mirrors the reference's norm_sum).
        corr = jnp.float32(2.0 * (n_pad - n_valid) + math.exp(1.0 / tau))
        tiny = jnp.float32(1e-30)
        li = jnp.log(jnp.maximum(acc_i_ref[...] - corr, tiny)) - pos
        lj = jnp.log(jnp.maximum(acc_j_ref[...] - corr, tiny)) - pos
        # Mask padded rows and reduce the tile to a single partial sum, stored
        # lane-dense (one unmasked vector store per row tile).
        row_idx = r * tm + lax.broadcasted_iota(jnp.int32, (tm, 1), 0)
        contrib = jnp.where(row_idx < n_valid, li + lj, 0.0)         # [TM, 1]
        tile_sum = jnp.sum(contrib, axis=0, keepdims=True)           # [1, 1]
        out_ref[...] = jnp.broadcast_to(tile_sum, (1, _LANE))


def _pick_tiles(d_pad, dtype_bytes):
    kind = ""
    try:
        kind = jax.devices()[0].device_kind.lower()
    except Exception:
        pass
    if "v6" in kind or "trillium" in kind:
        tm, tn = 256, 256            # 2x256 MXU, 128 MiB VMEM
    elif "v7" in kind or "7x" in kind:
        tm, tn = 256, 256            # 2x256 MXU; VMEM re-checked below (64 MiB)
    elif "v5" in kind:
        tm, tn = 256, 128            # 4x128 MXU: TN=128, TM=256 amortizes col streaming
    else:
        tm, tn = 128, 128
    # Keep the double-buffered operand footprint (2 row specs + 2 col specs,
    # 2 buffers each) comfortably under the default scoped-VMEM limit.
    if 4 * (tm + tn) * d_pad * dtype_bytes > (20 << 20):
        tm, tn = 128, 128
    return tm, tn


def contrastive_loss(xi, xj, tau=2.0, normalize=True, *,
                     matmul_dtype=jnp.bfloat16, tm=None, tn=None):
    """Pallas TPU equivalent of the PyTorch contrastive_loss.forward."""
    assert xi.shape == xj.shape and xi.ndim == 2
    n, d = xi.shape
    d_pad = _round_up(d, _LANE)
    dtype_bytes = jnp.dtype(matmul_dtype).itemsize
    if tm is None or tn is None:
        tm_d, tn_d = _pick_tiles(d_pad, dtype_bytes)
        tm = tm if tm is not None else tm_d
        tn = tn if tn is not None else tn_d
    n_pad = _round_up(n, max(tm, tn))

    inv_sqrt_tau = 1.0 / math.sqrt(float(tau))

    def _prep(a):
        # Single fused pass: f32 normalize, fold sqrt(1/tau), pad, cast once.
        a = a.astype(jnp.float32)
        if normalize:
            sq = jnp.sum(a * a, axis=1, keepdims=True)
            a = a * lax.rsqrt(jnp.maximum(sq, jnp.float32(1e-32)))
        a = a * jnp.float32(inv_sqrt_tau)
        if n_pad != n or d_pad != d:
            a = jnp.pad(a, ((0, n_pad - n), (0, d_pad - d)))
        return a.astype(matmul_dtype)

    xi_p = _prep(xi)
    xj_p = _prep(xj)

    kernel = functools.partial(_ntxent_kernel, n_valid=n, n_pad=n_pad,
                               tau=float(tau), tm=tm)

    row_spec = pl.BlockSpec((tm, d_pad), lambda r, c: (r, 0))
    col_spec = pl.BlockSpec((tn, d_pad), lambda r, c: (c, 0))
    grid = (n_pad // tm, n_pad // tn)

    partial_sums = pl.pallas_call(
        kernel,
        out_shape=jax.ShapeDtypeStruct((grid[0], _LANE), jnp.float32),
        grid_spec=pltpu.PrefetchScalarGridSpec(
            num_scalar_prefetch=0,
            grid=grid,
            in_specs=[row_spec, row_spec, col_spec, col_spec],
            out_specs=pl.BlockSpec((1, _LANE), lambda r, c: (r, 0)),
            scratch_shapes=[pltpu.VMEM((tm, 1), jnp.float32),
                            pltpu.VMEM((tm, 1), jnp.float32)],
        ),
        compiler_params=pltpu.CompilerParams(
            dimension_semantics=("parallel", "arbitrary")),
    )(xi_p, xj_p, xi_p, xj_p)

    # Partial sums are replicated across lanes; take lane 0 and average over 2N.
    return jnp.sum(partial_sums[:, 0]) / jnp.float32(2 * n)


def _reference_loss(xi, xj, tau=2.0, normalize=True):
    """Pure-JAX reference mirroring the PyTorch code exactly."""
    x = jnp.concatenate([xi, xj], axis=0).astype(jnp.float32)
    sim_mat = x @ x.T
    if normalize:
        nrm = jnp.linalg.norm(x, axis=1, keepdims=True)
        sim_mat = sim_mat / jnp.maximum(nrm @ nrm.T, 1e-16)
    sim_mat = jnp.exp(sim_mat / tau)
    if normalize:
        denom = jnp.linalg.norm(xi, axis=1) * jnp.linalg.norm(xj, axis=1)
        sim_match = jnp.exp(jnp.sum(xi * xj, axis=-1) / denom / tau)
    else:
        sim_match = jnp.exp(jnp.sum(xi * xj, axis=-1) / tau)
    sim_match = jnp.concatenate([sim_match, sim_match], axis=0)
    norm_sum = jnp.exp(jnp.ones(x.shape[0]) / tau)
    return jnp.mean(-jnp.log(sim_match / (jnp.sum(sim_mat, axis=-1) - norm_sum)))


if __name__ == "__main__":
    key = jax.random.PRNGKey(0)
    k_i, k_j = jax.random.split(key)
    N, D = 8, 32
    xi = jax.random.normal(k_i, (N, D), dtype=jnp.float32)
    xj = jax.random.normal(k_j, (N, D), dtype=jnp.float32)

    ref = _reference_loss(xi, xj, tau=2.0, normalize=True)
    ref_nn = _reference_loss(xi, xj, tau=2.0, normalize=False)

    # Exact-precision path (f32 MXU operands) -> tight tolerance.
    loss_f32 = contrastive_loss(xi, xj, tau=2.0, normalize=True,
                                matmul_dtype=jnp.float32)
    jax.block_until_ready(loss_f32)
    assert jnp.allclose(loss_f32, ref, rtol=1e-5, atol=1e-5), (loss_f32, ref)

    loss_f32_nn = contrastive_loss(xi, xj, tau=2.0, normalize=False,
                                   matmul_dtype=jnp.float32)
    jax.block_until_ready(loss_f32_nn)
    assert jnp.allclose(loss_f32_nn, ref_nn, rtol=1e-5, atol=1e-5), (loss_f32_nn, ref_nn)

    # Fast default path (bf16 streaming + bf16 MXU operands, f32 accumulate).
    loss_bf16 = contrastive_loss(xi, xj, tau=2.0, normalize=True)
    jax.block_until_ready(loss_bf16)
    assert jnp.allclose(loss_bf16, ref, rtol=5e-2, atol=5e-2), (loss_bf16, ref)

    print("KERNEL_OK")
</pallas_src>

<mosaic_0001>
module attributes {stable_mosaic.version = 11 : i64} {
  func.func @_ntxent_kernel(%arg0: i32, %arg1: i32, %arg2: memref<128x128xf32, #tpu.memory_space<vmem>>, %arg3: memref<128x128xf32, #tpu.memory_space<vmem>>, %arg4: memref<128x128xf32, #tpu.memory_space<vmem>>, %arg5: memref<128x128xf32, #tpu.memory_space<vmem>>, %arg6: memref<1x128xf32, #tpu.memory_space<vmem>>, %arg7: memref<128x1xf32, #tpu.memory_space<vmem>>, %arg8: memref<128x1xf32, #tpu.memory_space<vmem>>) attributes {dimension_semantics = [#tpu.dimension_semantics<parallel>, #tpu.dimension_semantics<arbitrary>], iteration_bounds = array<i64: 1, 1>, scalar_prefetch = 0 : i64, scratch_operands = 2 : i64, tpu.core_type = #tpu.core_type<tc>, window_params = [{transform_indices = @transform_0, window_bounds = array<i64: 128, 128>}, {transform_indices = @transform_1, window_bounds = array<i64: 128, 128>}, {transform_indices = @transform_2, window_bounds = array<i64: 128, 128>}, {transform_indices = @transform_3, window_bounds = array<i64: 128, 128>}, {transform_indices = @transform_4, window_bounds = array<i64: 1, 128>}]} {
    %c0_i32 = arith.constant 0 : i32
    %0 = arith.cmpi eq, %arg1, %c0_i32 : i32
    %1 = arith.extui %0 : i1 to i32
    %c0_i32_0 = arith.constant 0 : i32
    %2 = arith.cmpi ne, %1, %c0_i32_0 : i32
    scf.if %2 {
      %cst_23 = arith.constant 0.000000e+00 : f32
      %30 = vector.broadcast %cst_23 : f32 to vector<128x1xf32>
      %c0_24 = arith.constant 0 : index
      %c0_25 = arith.constant 0 : index
      %31 = vector.load %arg7[%c0_24, %c0_25] : memref<128x1xf32, #tpu.memory_space<vmem>>, vector<128x1xf32>
      tpu.vector_store %arg7[%c0_24, %c0_25], %30 {strides = array<i32>} : memref<128x1xf32, #tpu.memory_space<vmem>>, vector<128x1xf32>,
      %cst_26 = arith.constant 0.000000e+00 : f32
      %32 = vector.broadcast %cst_26 : f32 to vector<128x1xf32>
      %c0_27 = arith.constant 0 : index
      %c0_28 = arith.constant 0 : index
      %33 = vector.load %arg8[%c0_27, %c0_28] : memref<128x1xf32, #tpu.memory_space<vmem>>, vector<128x1xf32>
      tpu.vector_store %arg8[%c0_27, %c0_28], %32 {strides = array<i32>} : memref<128x1xf32, #tpu.memory_space<vmem>>, vector<128x1xf32>,
    } else {
    }
    %c0 = arith.constant 0 : index
    %c0_1 = arith.constant 0 : index
    %3 = vector.load %arg2[%c0, %c0_1] : memref<128x128xf32, #tpu.memory_space<vmem>>, vector<128x128xf32>
    %c0_2 = arith.constant 0 : index
    %c0_3 = arith.constant 0 : index
    %4 = vector.load %arg3[%c0_2, %c0_3] : memref<128x128xf32, #tpu.memory_space<vmem>>, vector<128x128xf32>
    %c0_4 = arith.constant 0 : index
    %c0_5 = arith.constant 0 : index
    %5 = vector.load %arg4[%c0_4, %c0_5] : memref<128x128xf32, #tpu.memory_space<vmem>>, vector<128x128xf32>
    %c0_6 = arith.constant 0 : index
    %c0_7 = arith.constant 0 : index
    %6 = vector.load %arg5[%c0_6, %c0_7] : memref<128x128xf32, #tpu.memory_space<vmem>>, vector<128x128xf32>
    %cst = arith.constant dense<0.000000e+00> : vector<128x128xf32>
    %7 = tpu.matmul %3, %5, %cst {dimension_numbers = #tpu.dot_dimension_numbers<[1], [1], [0], [0], [0, 0, 1, 0], [], []>} : vector<128x128xf32>, vector<128x128xf32>, vector<128x128xf32> -> vector<128x128xf32>
    %cst_8 = arith.constant dense<0.000000e+00> : vector<128x128xf32>
    %8 = tpu.matmul %3, %6, %cst_8 {dimension_numbers = #tpu.dot_dimension_numbers<[1], [1], [0], [0], [0, 0, 1, 0], [], []>} : vector<128x128xf32>, vector<128x128xf32>, vector<128x128xf32> -> vector<128x128xf32>
    %c0_9 = arith.constant 0 : index
    %c0_10 = arith.constant 0 : index
    %9 = vector.load %arg7[%c0_9, %c0_10] : memref<128x1xf32, #tpu.memory_space<vmem>>, vector<128x1xf32>
    %10 = math.exp %7 : vector<128x128xf32>
    %11 = math.exp %8 : vector<128x128xf32>
    %12 = arith.addf %10, %11 : vector<128x128xf32>
    %cst_11 = arith.constant dense<0.000000e+00> : vector<128xf32>
    %13 = vector.multi_reduction <add>, %12, %cst_11 [1] : vector<128x128xf32> to vector<128xf32>
    %14 = vector.shape_cast %13 : vector<128xf32> to vector<128x1xf32>
    %15 = arith.addf %9, %14 : vector<128x1xf32>
    %c0_12 = arith.constant 0 : index
    %c0_13 = arith.constant 0 : index
    %16 = vector.load %arg7[%c0_12, %c0_13] : memref<128x1xf32, #tpu.memory_space<vmem>>, vector<128x1xf32>
    tpu.vector_store %arg7[%c0_12, %c0_13], %15 {strides = array<i32>} : memref<128x1xf32, #tpu.memory_space<vmem>>, vector<128x1xf32>,
    %cst_14 = arith.constant dense<0.000000e+00> : vector<128x128xf32>
    %17 = tpu.matmul %4, %5, %cst_14 {dimension_numbers = #tpu.dot_dimension_numbers<[1], [1], [0], [0], [0, 0, 1, 0], [], []>} : vector<128x128xf32>, vector<128x128xf32>, vector<128x128xf32> -> vector<128x128xf32>
    %cst_15 = arith.constant dense<0.000000e+00> : vector<128x128xf32>
    %18 = tpu.matmul %4, %6, %cst_15 {dimension_numbers = #tpu.dot_dimension_numbers<[1], [1], [0], [0], [0, 0, 1, 0], [], []>} : vector<128x128xf32>, vector<128x128xf32>, vector<128x128xf32> -> vector<128x128xf32>
    %c0_16 = arith.constant 0 : index
    %c0_17 = arith.constant 0 : index
    %19 = vector.load %arg8[%c0_16, %c0_17] : memref<128x1xf32, #tpu.memory_space<vmem>>, vector<128x1xf32>
    %20 = math.exp %17 : vector<128x128xf32>
    %21 = math.exp %18 : vector<128x128xf32>
    %22 = arith.addf %20, %21 : vector<128x128xf32>
    %cst_18 = arith.constant dense<0.000000e+00> : vector<128xf32>
    %23 = vector.multi_reduction <add>, %22, %cst_18 [1] : vector<128x128xf32> to vector<128xf32>
    %24 = vector.shape_cast %23 : vector<128xf32> to vector<128x1xf32>
    %25 = arith.addf %19, %24 : vector<128x1xf32>
    %c0_19 = arith.constant 0 : index
    %c0_20 = arith.constant 0 : index
    %26 = vector.load %arg8[%c0_19, %c0_20] : memref<128x1xf32, #tpu.memory_space<vmem>>, vector<128x1xf32>
    tpu.vector_store %arg8[%c0_19, %c0_20], %25 {strides = array<i32>} : memref<128x1xf32, #tpu.memory_space<vmem>>, vector<128x1xf32>,
    %c0_i32_21 = arith.constant 0 : i32
    %27 = arith.cmpi eq, %arg1, %c0_i32_21 : i32
    %28 = arith.extui %27 : i1 to i32
    %c0_i32_22 = arith.constant 0 : i32
    %29 = arith.cmpi ne, %28, %c0_i32_22 : i32
    scf.if %29 {
      %30 = arith.mulf %3, %4 : vector<128x128xf32>
      %cst_23 = arith.constant dense<0.000000e+00> : vector<128xf32>
      %31 = vector.multi_reduction <add>, %30, %cst_23 [1] : vector<128x128xf32> to vector<128xf32>
      %32 = vector.shape_cast %31 : vector<128xf32> to vector<128x1xf32>
      %c0_24 = arith.constant 0 : index
      %c0_25 = arith.constant 0 : index
      %33 = vector.load %arg7[%c0_24, %c0_25] : memref<128x1xf32, #tpu.memory_space<vmem>>, vector<128x1xf32>
      %cst_26 = arith.constant 241.648727 : f32
      %34 = vector.broadcast %cst_26 : f32 to vector<128x1xf32>
      %35 = arith.subf %33, %34 : vector<128x1xf32>
      %cst_27 = arith.constant 1.000000e-30 : f32
      %36 = vector.broadcast %cst_27 : f32 to vector<128x1xf32>
      %37 = arith.maximumf %35, %36 : vector<128x1xf32>
      %38 = math.log %37 : vector<128x1xf32>
      %39 = arith.subf %38, %32 : vector<128x1xf32>
      %c0_28 = arith.constant 0 : index
      %c0_29 = arith.constant 0 : index
      %40 = vector.load %arg8[%c0_28, %c0_29] : memref<128x1xf32, #tpu.memory_space<vmem>>, vector<128x1xf32>
      %cst_30 = arith.constant 241.648727 : f32
      %41 = vector.broadcast %cst_30 : f32 to vector<128x1xf32>
      %42 = arith.subf %40, %41 : vector<128x1xf32>
      %cst_31 = arith.constant 1.000000e-30 : f32
      %43 = vector.broadcast %cst_31 : f32 to vector<128x1xf32>
      %44 = arith.maximumf %42, %43 : vector<128x1xf32>
      %45 = math.log %44 : vector<128x1xf32>
      %46 = arith.subf %45, %32 : vector<128x1xf32>
      %c128_i32 = arith.constant 128 : i32
      %47 = arith.muli %arg0, %c128_i32 : i32
      %48 = tpu.iota {dimensions = array<i32: 0>} : vector<128x1xi32>
      %49 = vector.broadcast %47 : i32 to vector<128x1xi32>
      %50 = arith.addi %49, %48 : vector<128x1xi32>
      %c8_i32 = arith.constant 8 : i32
      %51 = vector.broadcast %c8_i32 : i32 to vector<128x1xi32>
      %52 = arith.cmpi slt, %50, %51 : vector<128x1xi32>
      %53 = arith.addf %39, %46 : vector<128x1xf32>
      %cst_32 = arith.constant 0.000000e+00 : f32
      %54 = vector.broadcast %cst_32 : f32 to vector<128x1xf32>
      %55 = arith.select %52, %53, %54 : vector<128x1xi1>, vector<128x1xf32>
      %cst_33 = arith.constant dense<0.000000e+00> : vector<1xf32>
      %56 = vector.multi_reduction <add>, %55, %cst_33 [0] : vector<128x1xf32> to vector<1xf32>
      %57 = vector.shape_cast %56 : vector<1xf32> to vector<1x1xf32>
      %58 = vector.shape_cast %57 : vector<1x1xf32> to vector<1x1xf32>
      %59 = vector.broadcast %58 : vector<1x1xf32> to vector<1x128xf32>
      %c0_34 = arith.constant 0 : index
      %c0_35 = arith.constant 0 : index
      %60 = vector.load %arg6[%c0_34, %c0_35] : memref<1x128xf32, #tpu.memory_space<vmem>>, vector<1x128xf32>
      tpu.vector_store %arg6[%c0_34, %c0_35], %59 {strides = array<i32>} : memref<1x128xf32, #tpu.memory_space<vmem>>, vector<1x128xf32>,
    } else {
    }
    return
  }
  func.func @transform_0(%arg0: i32, %arg1: i32) -> (i32, i32) {
    %c0_i32 = arith.constant 0 : i32
    %c0_i32_0 = arith.constant 0 : i32
    return %arg0, %c0_i32 : i32, i32
  }
  func.func @transform_1(%arg0: i32, %arg1: i32) -> (i32, i32) {
    %c0_i32 = arith.constant 0 : i32
    %c0_i32_0 = arith.constant 0 : i32
    return %arg0, %c0_i32 : i32, i32
  }
  func.func @transform_2(%arg0: i32, %arg1: i32) -> (i32, i32) {
    %c0_i32 = arith.constant 0 : i32
    %c0_i32_0 = arith.constant 0 : i32
    return %arg1, %c0_i32 : i32, i32
  }
  func.func @transform_3(%arg0: i32, %arg1: i32) -> (i32, i32) {
    %c0_i32 = arith.constant 0 : i32
    %c0_i32_0 = arith.constant 0 : i32
    return %arg1, %c0_i32 : i32, i32
  }
  func.func @transform_4(%arg0: i32, %arg1: i32) -> (i32, i32) {
    %c0_i32 = arith.constant 0 : i32
    %c0_i32_0 = arith.constant 0 : i32
    return %arg0, %c0_i32 : i32, i32
  }
}

</mosaic_0001>

<bundles_post_ra>
// kernel: tpu_custom_call.1
= control target key start
LH: loop header
LB: loop body
LE: loop exit
PB: predicated region body
PF: predicated region fallthrough
CT: control target
= control target key end

     0   :  { %9 = vsyncpa [#allocation5], 0  ;;  %s2554_s0 = inlined_call_operand.hbm [shape: f32[128,128], index: 0, kind: input, shape index: {}]   ;;  %s2555_s1 = inlined_call_operand.hbm [shape: f32[128,128], index: 1, kind: input, shape index: {}]   ;;  %s2556_s2 = inlined_call_operand.hbm [shape: f32[128,128], index: 2, kind: input, shape index: {}]   ;;  %s2557_s3 = inlined_call_operand.hbm [shape: f32[128,128], index: 3, kind: input, shape index: {}]   ;;  %s2558_s4 = inlined_call_operand.hbm [shape: f32[1,128], index: 4, kind: output, shape index: {}]  }
   0x1   :  { %10 = vsyncpa [#allocation8], 0 }
   0x2   :  { %11 = vsyncpa [#allocation11], 0 }
   0x3   :  { %12 = vsyncpa [#allocation6], 0  ;;  %s2234_s15 = smov [#allocation7]   ;;  %s2235_s17 = smov [#allocation4]  }
   0x4   :  { %s30_s16 = sshll.u32 %s2234_s15, 4  ;;  %s18_s18 = sshll.u32 %s2235_s17, 4  ;;  %s31_s16 = int_to_ptr.vmem [resolvable:$true] %s30_s16  ;;  %s2268_s18 = int_to_ptr.vmem [resolvable:$true] %s18_s18 }
   0x5   :  { %s2116_s21 = scalar_lea.hbm %s2555_s1, 2048 }
   0x6   :  { %p2117_p0 = scmp.ne.s32.totalorder %s2555_s1, %s2116_s21  ;;  %p2120_p1 = scmp.lt.u32.totalorder %s2116_s21, %s2555_s1 }
   0x8   :  { %p2122_p2 = pnand %p2120_p1, %p2117_p0 }
   0xa   :  { %2125 = shalt.err (!%p2122_p2)
}
   0xb   :  { %s2126_s26 = scalar_lea.vmem %s31_s16, 2048  ;;  %p2131_p4 = scmp.lt.s32.totalorder %s31_s16, %s31_s16 }
   0xc   :  { %p2127_p3 = scmp.ne.s32.totalorder %s31_s16, %s2126_s26  ;;  %p2132_p5 = scmp.lt.s32.totalorder %s2126_s26, %s2126_s26 }
   0xe   :  { %p2133_p6 = por %p2132_p5, %p2131_p4 }
  0x10   :  { %p2134_p7 = pnand %p2133_p6, %p2127_p3 }
  0x12   :  { %2137 = shalt.err (!%p2134_p7)
}
  0x13   :  { %s2236_s27 = smov 128   ;;  %s2237_s28 = smov 8  }
  0x14   :  { %36 = dma.hbm_to_vmem [thread:$0]  %s2555_s1, 2048, %s31_s16, [#allocation8], %s2236_s27, %s2236_s27, %s2237_s28  }
  0x15   :  { %s2138_s7 = scalar_lea.hbm %s2554_s0, 2048 }
  0x16   :  { %p2139_p8 = scmp.ne.s32.totalorder %s2554_s0, %s2138_s7  ;;  %p2142_p9 = scmp.lt.u32.totalorder %s2138_s7, %s2554_s0 }
  0x18   :  { %p2144_p10 = pnand %p2142_p9, %p2139_p8 }
  0x1a   :  { %2147 = shalt.err (!%p2144_p10)
}
  0x1b   :  { %s2148_s12 = scalar_lea.vmem %s2268_s18, 2048  ;;  %p2153_p12 = scmp.lt.s32.totalorder %s2268_s18, %s2268_s18 }
  0x1c   :  { %p2149_p11 = scmp.ne.s32.totalorder %s2268_s18, %s2148_s12  ;;  %p2154_p13 = scmp.lt.s32.totalorder %s2148_s12, %s2148_s12 }
  0x1e   :  { %p2155_p0 = por %p2154_p13, %p2153_p12 }
  0x20   :  { %p2156_p1 = pnand %p2155_p0, %p2149_p11 }
  0x22   :  { %2159 = shalt.err (!%p2156_p1)
}
  0x23   :  { %24 = dma.hbm_to_vmem [thread:$0]  %s2554_s0, 2048, %s2268_s18, [#allocation5], %s2236_s27, %s2236_s27, %s2237_s28  }
  0x24   :  { %s2238_s14 = smov [#allocation9]   ;;  %s2239_s16 = smov [#allocation10]  }
  0x25   :  { %s42_s15 = sshll.u32 %s2238_s14, 4  ;;  %s54_s17 = sshll.u32 %s2239_s16, 4  ;;  %s43_s15 = int_to_ptr.vmem [resolvable:$true] %s42_s15  ;;  %s2305_s17 = int_to_ptr.vmem [resolvable:$true] %s54_s17 }
  0x26   :  { %s2160_s21 = scalar_lea.hbm %s2556_s2, 2048 }
  0x27   :  { %p2161_p2 = scmp.ne.s32.totalorder %s2556_s2, %s2160_s21  ;;  %p2164_p3 = scmp.lt.u32.totalorder %s2160_s21, %s2556_s2 }
  0x29   :  { %p2166_p4 = pnand %p2164_p3, %p2161_p2 }
  0x2b   :  { %2169 = shalt.err (!%p2166_p4)
}
  0x2c   :  { %s2170_s0 = scalar_lea.vmem %s43_s15, 2048  ;;  %p2175_p6 = scmp.lt.s32.totalorder %s43_s15, %s43_s15 }
  0x2d   :  { %p2171_p5 = scmp.ne.s32.totalorder %s43_s15, %s2170_s0  ;;  %p2176_p7 = scmp.lt.s32.totalorder %s2170_s0, %s2170_s0 }
  0x2f   :  { %p2177_p8 = por %p2176_p7, %p2175_p6 }
  0x31   :  { %p2178_p9 = pnand %p2177_p8, %p2171_p5 }
  0x33   :  { %2181 = shalt.err (!%p2178_p9)
}
  0x34   :  { %48 = dma.hbm_to_vmem [thread:$0]  %s2556_s2, 2048, %s43_s15, [#allocation8], %s2236_s27, %s2236_s27, %s2237_s28  }
  0x35   :  { %s2182_s5 = scalar_lea.hbm %s2557_s3, 2048 }
  0x36   :  { %p2183_p10 = scmp.ne.s32.totalorder %s2557_s3, %s2182_s5  ;;  %p2186_p11 = scmp.lt.u32.totalorder %s2182_s5, %s2557_s3 }
  0x38   :  { %p2188_p12 = pnand %p2186_p11, %p2183_p10 }
  0x3a   :  { %2191 = shalt.err (!%p2188_p12)
}
  0x3b   :  { %s2192_s10 = scalar_lea.vmem %s2305_s17, 2048  ;;  %p2197_p0 = scmp.lt.s32.totalorder %s2305_s17, %s2305_s17 }
  0x3c   :  { %p2193_p13 = scmp.ne.s32.totalorder %s2305_s17, %s2192_s10  ;;  %p2198_p1 = scmp.lt.s32.totalorder %s2192_s10, %s2192_s10 }
  0x3e   :  { %p2199_p2 = por %p2198_p1, %p2197_p0 }
  0x40   :  { %p2200_p3 = pnand %p2199_p2, %p2193_p13 }
  0x42   :  { %2203 = shalt.err (!%p2200_p3)
}
  0x43   :  { %60 = dma.hbm_to_vmem [thread:$0]  %s2557_s3, 2048, %s2305_s17, [#allocation11], %s2236_s27, %s2236_s27, %s2237_s28  }
  0x44   :  { %2226 = dma.done.wait [#allocation5], 2048  }
  0x45   :  { %2227 = vsyncadd [#allocation5], 4294965248 }
  0x46   :  { %2228 = dma.done.wait [#allocation8], 4096  }
  0x47   :  { %2229 = vsyncadd [#allocation8], 4294963200 }
  0x48   :  { %2230 = dma.done.wait [#allocation11], 2048  }
  0x49   :  { %2231 = vsyncadd [#allocation11], 4294965248  ;;  %v142_v0 = vld [vmem:[#allocation9] sm:$0xff]  ;;  %v143_v1 = vld [vmem:[#allocation9 + $0x8] sm:$0xff]  ;;  %vm77_vm0 = vcmask 7168   ;;  %s2242_s3 = smov [#allocation12]  }
  0x4a   :  { %v158_v2 = vld [vmem:[#allocation10] sm:$0xff]  ;;  %v2342_v3 = vpack.c.bf16 %v143_v1, %v142_v0  ;;  %v159_v4 = vld [vmem:[#allocation10 + $0x8] sm:$0xff]  ;;  %v144_v5 = vld [vmem:[#allocation9 + $0x10] sm:$0xff]  ;;  %s1450_s27 = sshll.u32 %s2242_s3, 4  ;;  %s1451_s27 = int_to_ptr.vmem [resolvable:$true] %s1450_s27 }
  0x4b   :  { %v145_v6 = vld [vmem:[#allocation9 + $0x18] sm:$0xff]  ;;  %v2344_v7 = vpack.c.bf16 %v159_v4, %v158_v2  ;;  %v160_v9 = vld [vmem:[#allocation10 + $0x10] sm:$0xff]  ;;  %v146_v12 = vld [vmem:[#allocation9 + $0x20] sm:$0xff]  ;;  %s2204_s28 = scalar_lea.vmem %s1451_s27, 16  ;;  %s2208_s12 = scalar_lea.vmem %s1451_s27, 32 }
  0x4c   :  { %v2346_v8 = vpack.c.bf16 %v145_v6, %v144_v5  ;;  %v161_v10 = vld [vmem:[#allocation10 + $0x18] sm:$0xff]  ;;  %1846 = vmatprep.subr.bf16.mxu0 %v2342_v3  ;;  %v147_v13 = vld [vmem:[#allocation9 + $0x28] sm:$0xff]  ;;  %v162_v14 = vld [vmem:[#allocation10 + $0x20] sm:$0xff]  ;;  %p2205_p4 = scmp.ne.s32.totalorder %s1451_s27, %s2204_s28  ;;  %p2209_p5 = scmp.lt.s32.totalorder %s1451_s27, %s1451_s27 }
  0x4d   :  { %v2349_v11 = vpack.c.bf16 %v161_v10, %v160_v9  ;;  %1878 = vmatprep.subr.bf16.mxu1 %v2344_v7  ;;  %1848 = vmatpush3.bf16.xpose.msra.mxu0 %v2342_v3  ;;  %v163_v15 = vld [vmem:[#allocation10 + $0x28] sm:$0xff]  ;;  %v2356_v16 = vpack.c.bf16 %v147_v13, %v146_v12  ;;  %v2360_v18 = vld [vmem:[#allocation4] sm:$0xff]  ;;  %v148_v19 = vld [vmem:[#allocation9 + $0x30] sm:$0xff]  ;;  %p2210_p6 = scmp.lt.s32.totalorder %s2208_s12, %s2204_s28 }
  0x4e   :  { %1880 = vmatpush3.bf16.xpose.msra.mxu1 %v2344_v7  ;;  %1850 = vmatprep.subr.bf16.mxu0 %v2346_v8  ;;  %v2358_v17 = vpack.c.bf16 %v163_v15, %v162_v14  ;;  %v149_v20 = vld [vmem:[#allocation9 + $0x38] sm:$0xff]  ;;  %v164_v21 = vld [vmem:[#allocation10 + $0x30] sm:$0xff]  ;;  %v150_v25 = vld [vmem:[#allocation9 + $0x40] sm:$0xff] }
  0x4f   :  { %1882 = vmatprep.subr.bf16.mxu1 %v2349_v11  ;;  %1653 = vmatprep.mubr.f32.mxu0 %v2360_v18  ;;  %v165_v22 = vld [vmem:[#allocation10 + $0x38] sm:$0xff]  ;;  %v2368_v23 = vpack.c.bf16 %v149_v20, %v148_v19  ;;  %v151_v26 = vld [vmem:[#allocation9 + $0x48] sm:$0xff]  ;;  %v166_v27 = vld [vmem:[#allocation10 + $0x40] sm:$0xff]  ;;  %p2211_p7 = por %p2210_p6, %p2209_p5 }
  0x50   :  { %1709 = vmatprep.mubr.f32.mxu1 %v2360_v18  ;;  %v2370_v24 = vpack.c.bf16 %v165_v22, %v164_v21  ;;  %v167_v28 = vld [vmem:[#allocation10 + $0x48] sm:$0xff]  ;;  %v2376_v29 = vpack.c.bf16 %v151_v26, %v150_v25  ;;  %v152_v31 = vld [vmem:[#allocation9 + $0x50] sm:$0xff]  ;;  %v153_v32 = vld [vmem:[#allocation9 + $0x58] sm:$0xff] }
  0x51   :  { %v2378_v30 = vpack.c.bf16 %v167_v28, %v166_v27  ;;  %v168_v33 = vld [vmem:[#allocation10 + $0x50] sm:$0xff]  ;;  %v169_v34 = vld [vmem:[#allocation10 + $0x58] sm:$0xff]  ;;  %v2384_v35 = vpack.c.bf16 %v153_v32, %v152_v31  ;;  %v154_v37 = vld [vmem:[#allocation9 + $0x60] sm:$0xff]  ;;  %p2212_p8 = pnand %p2211_p7, %p2205_p4 }
  0x52   :  { %v2386_v36 = vpack.c.bf16 %v169_v34, %v168_v33  ;;  %v155_v38 = vld [vmem:[#allocation9 + $0x68] sm:$0xff]  ;;  %v170_v39 = vld [vmem:[#allocation10 + $0x60] sm:$0xff]  ;;  %v156_v43 = vld [vmem:[#allocation9 + $0x70] sm:$0xff] }
  0x53   :  { %v171_v40 = vld [vmem:[#allocation10 + $0x68] sm:$0xff]  ;;  %v2392_v41 = vpack.c.bf16 %v155_v38, %v154_v37  ;;  %v157_v44 = vld [vmem:[#allocation9 + $0x78] sm:$0xff]  ;;  %v172_v45 = vld [vmem:[#allocation10 + $0x70] sm:$0xff] }
  0x54   :  { %v2394_v42 = vpack.c.bf16 %v171_v40, %v170_v39  ;;  %v173_v46 = vld [vmem:[#allocation10 + $0x78] sm:$0xff]  ;;  %v2400_v47 = vpack.c.bf16 %v157_v44, %v156_v43  ;;  %v111_v49 = vld [vmem:[#allocation4 + $0x8] sm:$0xff]  ;;  %v112_v50 = vld [vmem:[#allocation4 + $0x10] sm:$0xff] }
  0x55   :  { %1852 = vmatpush3.bf16.xpose.msra.mxu0 %v2346_v8  ;;  %v2402_v48 = vpack.c.bf16 %v173_v46, %v172_v45  ;;  %v113_v51 = vld [vmem:[#allocation4 + $0x18] sm:$0xff]  ;;  %v114_v52 = vld [vmem:[#allocation4 + $0x20] sm:$0xff]  ;;  %v115_v53 = vld [vmem:[#allocation4 + $0x28] sm:$0xff] }
  0x56   :  { %1884 = vmatpush3.bf16.xpose.msra.mxu1 %v2349_v11  ;;  %1854 = vmatprep.subr.bf16.mxu0 %v2356_v16  ;;  %v116_v54 = vld [vmem:[#allocation4 + $0x30] sm:$0xff]  ;;  %v117_v55 = vld [vmem:[#allocation4 + $0x38] sm:$0xff]  ;;  %v118_v56 = vld [vmem:[#allocation4 + $0x40] sm:$0xff] }
  0x57   :  { %1886 = vmatprep.subr.bf16.mxu1 %v2358_v17  ;;  %v119_v57 = vld [vmem:[#allocation4 + $0x48] sm:$0xff]  ;;  %v120_v58 = vld [vmem:[#allocation4 + $0x50] sm:$0xff]  ;;  %v121_v59 = vld [vmem:[#allocation4 + $0x58] sm:$0xff] }
  0x58   :  { %v122_v60 = vld [vmem:[#allocation4 + $0x60] sm:$0xff]  ;;  %v123_v61 = vld [vmem:[#allocation4 + $0x68] sm:$0xff]  ;;  %v124_v62 = vld [vmem:[#allocation4 + $0x70] sm:$0xff] }
  0x59   :  { %v125_v63 = vld [vmem:[#allocation4 + $0x78] sm:$0xff]  ;;  %v126_v0 = vld [vmem:[#allocation7] sm:$0xff]  ;;  %v127_v1 = vld [vmem:[#allocation7 + $0x8] sm:$0xff] }
  0x5a   :  { %v128_v2 = vld [vmem:[#allocation7 + $0x10] sm:$0xff]  ;;  %v130_v4 = vld [vmem:[#allocation7 + $0x20] sm:$0xff]  ;;  %v131_v5 = vld [vmem:[#allocation7 + $0x28] sm:$0xff]  ;;  %v1078_v9 = vmul.f32 %v126_v0, %v2360_v18 }
  0x5b   :  { %v132_v6 = vld [vmem:[#allocation7 + $0x30] sm:$0xff]  ;;  %v135_v10 = vld [vmem:[#allocation7 + $0x48] sm:$0xff]  ;;  %v137_v12 = vld [vmem:[#allocation7 + $0x58] sm:$0xff] }
  0x5c   :  { %1094 = vadd.xlane.f32.xlu1 %v1078_v9  ;;  %v138_v13 = vld [vmem:[#allocation7 + $0x60] sm:$0xff]  ;;  %v139_v14 = vld [vmem:[#allocation7 + $0x68] sm:$0xff]  ;;  %v140_v15 = vld [vmem:[#allocation7 + $0x70] sm:$0xff] }
  0x5d   :  { %1856 = vmatpush3.bf16.xpose.msra.mxu0 %v2356_v16 }
  0x5e   :  { %1888 = vmatpush3.bf16.xpose.msra.mxu1 %v2358_v17  ;;  %1858 = vmatprep.subr.bf16.mxu0 %v2368_v23 }
  0x5f   :  { %1890 = vmatprep.subr.bf16.mxu1 %v2370_v24 }
  0x65   :  { %1860 = vmatpush3.bf16.xpose.msra.mxu0 %v2368_v23 }
  0x66   :  { %1892 = vmatpush3.bf16.xpose.msra.mxu1 %v2370_v24  ;;  %1862 = vmatprep.subr.bf16.mxu0 %v2376_v29 }
  0x67   :  { %1894 = vmatprep.subr.bf16.mxu1 %v2378_v30 }
  0x6d   :  { %1864 = vmatpush3.bf16.xpose.msra.mxu0 %v2376_v29 }
  0x6e   :  { %1896 = vmatpush3.bf16.xpose.msra.mxu1 %v2378_v30  ;;  %1866 = vmatprep.subr.bf16.mxu0 %v2384_v35 }
  0x6f   :  { %1898 = vmatprep.subr.bf16.mxu1 %v2386_v36 }
  0x75   :  { %1868 = vmatpush3.bf16.xpose.msra.mxu0 %v2384_v35 }
  0x76   :  { %1900 = vmatpush3.bf16.xpose.msra.mxu1 %v2386_v36  ;;  %1870 = vmatprep.subr.bf16.mxu0 %v2392_v41 }
  0x77   :  { %1902 = vmatprep.subr.bf16.mxu1 %v2394_v42 }
  0x7d   :  { %1872 = vmatpush3.bf16.xpose.msra.mxu0 %v2392_v41 }
  0x7e   :  { %1904 = vmatpush3.bf16.xpose.msra.mxu1 %v2394_v42  ;;  %1874 = vmatprep.subr.bf16.mxu0 %v2400_v47 }
  0x7f   :  { %1906 = vmatprep.subr.bf16.mxu1 %v2402_v48 }
  0x85   :  { %1876 = vmatpush3.bf16.xpose.msra.mxu0 %v2400_v47 }
  0x86   :  { %1908 = vmatpush3.bf16.xpose.msra.mxu1 %v2402_v48  ;;  %1910 = vmatprep.subr.bf16.mxu0 %v2342_v3 }
  0x87   :  { %1942 = vmatprep.subr.bf16.mxu1 %v2344_v7 }
  0x8c   :  { %1654 = vmatmul.mubr.f32.vlgmr.msra.gmra.mrb[0].mxu0 %v111_v49 }
  0x8d   :  { %1710 = vmatmul.mubr.f32.vlgmr.msra.gmra.mrb[0].mxu1 %v111_v49  ;;  %1912 = vmatpush3.bf16.xpose.msra.mxu0 %v2342_v3  ;;  %v129_v3 = vld [vmem:[#allocation7 + $0x18] sm:$0xff] }
  0x8e   :  { %1944 = vmatpush3.bf16.xpose.msra.mxu1 %v2344_v7  ;;  %1914 = vmatprep.subr.bf16.mxu0 %v2346_v8  ;;  %v133_v7 = vld [vmem:[#allocation7 + $0x38] sm:$0xff] }
  0x8f   :  { %1946 = vmatprep.subr.bf16.mxu1 %v2349_v11  ;;  %1656 = vmatprep.mubr.f32.mxu0 %v112_v50 }
  0x90   :  { %1712 = vmatprep.mubr.f32.mxu1 %v112_v50  ;;  %1657 = vmatmul.mubr.f32.gmra.mrb[2].mxu0 %v113_v51 }
  0x91   :  { %1713 = vmatmul.mubr.f32.gmra.mrb[2].mxu1 %v113_v51  ;;  %1659 = vmatprep.mubr.f32.mxu0 %v114_v52 }
  0x92   :  { %1715 = vmatprep.mubr.f32.mxu1 %v114_v52 }
  0x94   :  { %1660 = vmatmul.mubr.f32.gmra.mrb[4].mxu0 %v115_v53 }
  0x95   :  { %1916 = vmatpush3.bf16.xpose.msra.mxu0 %v2346_v8  ;;  %1716 = vmatmul.mubr.f32.gmra.mrb[4].mxu1 %v115_v53  ;;  %v134_v8 = vld [vmem:[#allocation7 + $0x40] sm:$0xff] }
  0x96   :  { %1948 = vmatpush3.bf16.xpose.msra.mxu1 %v2349_v11  ;;  %1918 = vmatprep.subr.bf16.mxu0 %v2356_v16  ;;  %v136_v11 = vld [vmem:[#allocation7 + $0x50] sm:$0xff] }
  0x97   :  { %1950 = vmatprep.subr.bf16.mxu1 %v2358_v17  ;;  %1662 = vmatprep.mubr.f32.mxu0 %v116_v54 }
  0x98   :  { %1718 = vmatprep.mubr.f32.mxu1 %v116_v54  ;;  %1663 = vmatmul.mubr.f32.gmra.mrb[6].mxu0 %v117_v55 }
  0x99   :  { %1719 = vmatmul.mubr.f32.gmra.mrb[6].mxu1 %v117_v55  ;;  %1665 = vmatprep.mubr.f32.mxu0 %v118_v56 }
  0x9a   :  { %1721 = vmatprep.mubr.f32.mxu1 %v118_v56 }
  0x9c   :  { %1666 = vmatmul.mubr.f32.gmra.mrb[8].mxu0 %v119_v57 }
  0x9d   :  { %1920 = vmatpush3.bf16.xpose.msra.mxu0 %v2356_v16  ;;  %1722 = vmatmul.mubr.f32.gmra.mrb[8].mxu1 %v119_v57  ;;  %v141_v16 = vld [vmem:[#allocation7 + $0x78] sm:$0xff] }
  0x9e   :  { %1952 = vmatpush3.bf16.xpose.msra.mxu1 %v2358_v17  ;;  %1922 = vmatprep.subr.bf16.mxu0 %v2368_v23  ;;  %v2240_v17 = vmov 0.0  }
  0x9f   :  { %1954 = vmatprep.subr.bf16.mxu1 %v2370_v24  ;;  %1668 = vmatprep.mubr.f32.mxu0 %v120_v58  ;;  %79 = vst.msk [vmem:[#allocation2 + $0x8] sm:$0xff] %vm77_vm0, %v2240_v17  ;;  %78 = vst.msk [vmem:[#allocation2] sm:$0xff] %vm77_vm0, %v2240_v17 }
  0xa0   :  { %1724 = vmatprep.mubr.f32.mxu1 %v120_v58  ;;  %1669 = vmatmul.mubr.f32.gmra.mrb[10].mxu0 %v121_v59  ;;  %80 = vst.msk [vmem:[#allocation2 + $0x10] sm:$0xff] %vm77_vm0, %v2240_v17  ;;  %81 = vst.msk [vmem:[#allocation2 + $0x18] sm:$0xff] %vm77_vm0, %v2240_v17 }
  0xa1   :  { %1725 = vmatmul.mubr.f32.gmra.mrb[10].mxu1 %v121_v59  ;;  %1671 = vmatprep.mubr.f32.mxu0 %v122_v60  ;;  %82 = vst.msk [vmem:[#allocation2 + $0x20] sm:$0xff] %vm77_vm0, %v2240_v17  ;;  %83 = vst.msk [vmem:[#allocation2 + $0x28] sm:$0xff] %vm77_vm0, %v2240_v17 }
  0xa2   :  { %1727 = vmatprep.mubr.f32.mxu1 %v122_v60  ;;  %84 = vst.msk [vmem:[#allocation2 + $0x30] sm:$0xff] %vm77_vm0, %v2240_v17  ;;  %85 = vst.msk [vmem:[#allocation2 + $0x38] sm:$0xff] %vm77_vm0, %v2240_v17 }
  0xa3   :  { %86 = vst.msk [vmem:[#allocation2 + $0x40] sm:$0xff] %vm77_vm0, %v2240_v17  ;;  %87 = vst.msk [vmem:[#allocation2 + $0x48] sm:$0xff] %vm77_vm0, %v2240_v17 }
  0xa4   :  { %1672 = vmatmul.mubr.f32.gmra.mrb[12].mxu0 %v123_v61  ;;  %88 = vst.msk [vmem:[#allocation2 + $0x50] sm:$0xff] %vm77_vm0, %v2240_v17  ;;  %89 = vst.msk [vmem:[#allocation2 + $0x58] sm:$0xff] %vm77_vm0, %v2240_v17 }
  0xa5   :  { %1924 = vmatpush3.bf16.xpose.msra.mxu0 %v2368_v23  ;;  %1728 = vmatmul.mubr.f32.gmra.mrb[12].mxu1 %v123_v61  ;;  %90 = vst.msk [vmem:[#allocation2 + $0x60] sm:$0xff] %vm77_vm0, %v2240_v17  ;;  %91 = vst.msk [vmem:[#allocation2 + $0x68] sm:$0xff] %vm77_vm0, %v2240_v17 }
  0xa6   :  { %1956 = vmatpush3.bf16.xpose.msra.mxu1 %v2370_v24  ;;  %1926 = vmatprep.subr.bf16.mxu0 %v2376_v29  ;;  %92 = vst.msk [vmem:[#allocation2 + $0x70] sm:$0xff] %vm77_vm0, %v2240_v17  ;;  %93 = vst.msk [vmem:[#allocation2 + $0x78] sm:$0xff] %vm77_vm0, %v2240_v17 }
  0xa7   :  { %1958 = vmatprep.subr.bf16.mxu1 %v2378_v30  ;;  %1674 = vmatprep.mubr.f32.mxu0 %v124_v62  ;;  %94 = vst.msk [vmem:[#allocation3] sm:$0xff] %vm77_vm0, %v2240_v17  ;;  %95 = vst.msk [vmem:[#allocation3 + $0x8] sm:$0xff] %vm77_vm0, %v2240_v17 }
  0xa8   :  { %1730 = vmatprep.mubr.f32.mxu1 %v124_v62  ;;  %1675 = vmatmul.mubr.f32.gmra.mrb[14].mxu0 %v125_v63  ;;  %96 = vst.msk [vmem:[#allocation3 + $0x10] sm:$0xff] %vm77_vm0, %v2240_v17  ;;  %97 = vst.msk [vmem:[#allocation3 + $0x18] sm:$0xff] %vm77_vm0, %v2240_v17 }
  0xa9   :  { %1731 = vmatmul.mubr.f32.gmra.mrb[14].mxu1 %v125_v63  ;;  %1765 = vmatprep.mubr.f32.mxu0 %v126_v0  ;;  %98 = vst.msk [vmem:[#allocation3 + $0x20] sm:$0xff] %vm77_vm0, %v2240_v17  ;;  %99 = vst.msk [vmem:[#allocation3 + $0x28] sm:$0xff] %vm77_vm0, %v2240_v17 }
  0xaa   :  { %1821 = vmatprep.mubr.f32.mxu1 %v126_v0  ;;  %100 = vst.msk [vmem:[#allocation3 + $0x30] sm:$0xff] %vm77_vm0, %v2240_v17  ;;  %101 = vst.msk [vmem:[#allocation3 + $0x38] sm:$0xff] %vm77_vm0, %v2240_v17 }
  0xab   :  { %102 = vst.msk [vmem:[#allocation3 + $0x40] sm:$0xff] %vm77_vm0, %v2240_v17  ;;  %103 = vst.msk [vmem:[#allocation3 + $0x48] sm:$0xff] %vm77_vm0, %v2240_v17 }
  0xac   :  { %104 = vst.msk [vmem:[#allocation3 + $0x50] sm:$0xff] %vm77_vm0, %v2240_v17  ;;  %105 = vst.msk [vmem:[#allocation3 + $0x58] sm:$0xff] %vm77_vm0, %v2240_v17 }
  0xad   :  { %1928 = vmatpush3.bf16.xpose.msra.mxu0 %v2376_v29  ;;  %106 = vst.msk [vmem:[#allocation3 + $0x60] sm:$0xff] %vm77_vm0, %v2240_v17  ;;  %107 = vst.msk [vmem:[#allocation3 + $0x68] sm:$0xff] %vm77_vm0, %v2240_v17 }
  0xae   :  { %1960 = vmatpush3.bf16.xpose.msra.mxu1 %v2378_v30  ;;  %1930 = vmatprep.subr.bf16.mxu0 %v2384_v35  ;;  %108 = vst.msk [vmem:[#allocation3 + $0x70] sm:$0xff] %vm77_vm0, %v2240_v17  ;;  %109 = vst.msk [vmem:[#allocation3 + $0x78] sm:$0xff] %vm77_vm0, %v2240_v17 }
  0xaf   :  { %1962 = vmatprep.subr.bf16.mxu1 %v2386_v36 }
  0xb5   :  { %1932 = vmatpush3.bf16.xpose.msra.mxu0 %v2384_v35 }
  0xb6   :  { %1964 = vmatpush3.bf16.xpose.msra.mxu1 %v2386_v36  ;;  %1934 = vmatprep.subr.bf16.mxu0 %v2392_v41 }
  0xb7   :  { %1966 = vmatprep.subr.bf16.mxu1 %v2394_v42 }
  0xbd   :  { %1936 = vmatpush3.bf16.xpose.msra.mxu0 %v2392_v41 }
  0xbe   :  { %1968 = vmatpush3.bf16.xpose.msra.mxu1 %v2394_v42  ;;  %1938 = vmatprep.subr.bf16.mxu0 %v2400_v47 }
  0xbf   :  { %1970 = vmatprep.subr.bf16.mxu1 %v2402_v48 }
  0xc5   :  { %1940 = vmatpush3.bf16.xpose.msra.mxu0 %v2400_v47 }
  0xc6   :  { %1972 = vmatpush3.bf16.xpose.msra.mxu1 %v2402_v48 }
  0xcc   :  { %1766 = vmatmul.mubr.f32.vlgmr.msra.gmra.mrb[16].mxu0 %v127_v1 }
  0xcd   :  { %1822 = vmatmul.mubr.f32.vlgmr.msra.gmra.mrb[16].mxu1 %v127_v1  ;;  %1768 = vmatprep.mubr.f32.mxu0 %v128_v2 }
  0xce   :  { %1824 = vmatprep.mubr.f32.mxu1 %v128_v2 }
  0xd0   :  { %1769 = vmatmul.mubr.f32.gmra.mrb[18].mxu0 %v129_v3 }
  0xd1   :  { %1825 = vmatmul.mubr.f32.gmra.mrb[18].mxu1 %v129_v3  ;;  %1771 = vmatprep.mubr.f32.mxu0 %v130_v4 }
  0xd2   :  { %1827 = vmatprep.mubr.f32.mxu1 %v130_v4 }
  0xd4   :  { %1772 = vmatmul.mubr.f32.gmra.mrb[20].mxu0 %v131_v5 }
  0xd5   :  { %1828 = vmatmul.mubr.f32.gmra.mrb[20].mxu1 %v131_v5  ;;  %1774 = vmatprep.mubr.f32.mxu0 %v132_v6 }
  0xd6   :  { %1830 = vmatprep.mubr.f32.mxu1 %v132_v6 }
  0xd8   :  { %1775 = vmatmul.mubr.f32.gmra.mrb[22].mxu0 %v133_v7 }
  0xd9   :  { %1831 = vmatmul.mubr.f32.gmra.mrb[22].mxu1 %v133_v7  ;;  %1777 = vmatprep.mubr.f32.mxu0 %v134_v8 }
  0xda   :  { %1833 = vmatprep.mubr.f32.mxu1 %v134_v8 }
  0xdc   :  { %1778 = vmatmul.mubr.f32.gmra.mrb[24].mxu0 %v135_v10 }
  0xdd   :  { %1834 = vmatmul.mubr.f32.gmra.mrb[24].mxu1 %v135_v10  ;;  %1780 = vmatprep.mubr.f32.mxu0 %v136_v11 }
  0xde   :  { %1836 = vmatprep.mubr.f32.mxu1 %v136_v11 }
  0xe0   :  { %1781 = vmatmul.mubr.f32.gmra.mrb[26].mxu0 %v137_v12 }
  0xe1   :  { %1837 = vmatmul.mubr.f32.gmra.mrb[26].mxu1 %v137_v12  ;;  %1783 = vmatprep.mubr.f32.mxu0 %v138_v13 }
  0xe2   :  { %1839 = vmatprep.mubr.f32.mxu1 %v138_v13 }
  0xe4   :  { %1784 = vmatmul.mubr.f32.gmra.mrb[28].mxu0 %v139_v14 }
  0xe5   :  { %1840 = vmatmul.mubr.f32.gmra.mrb[28].mxu1 %v139_v14  ;;  %1786 = vmatprep.mubr.f32.mxu0 %v140_v15 }
  0xe6   :  { %1842 = vmatprep.mubr.f32.mxu1 %v140_v15 }
  0xe8   :  { %1787 = vmatmul.mubr.f32.gmra.mrb[30].mxu0 %v141_v16 }
  0xe9   :  { %1843 = vmatmul.mubr.f32.gmra.mrb[30].mxu1 %v141_v16 }
 0x15f   :  { %v1655_v18 = vpop.f32.mrb[0].mxu0 }
 0x160   :  { %v482_v19 = vmul.f32 1.442695, %v1655_v18  ;;  %v1711_v20 = vpop.f32.mrb[0].mxu1  ;;  %v240_v21 = vpop.f32.mrb[1].mxu0 }
 0x161   :  { %v514_v22 = vmul.f32 1.442695, %v1711_v20  ;;  %v480_v23 = vmul.f32 1.442695, %v240_v21  ;;  %v385_v24 = vpop.f32.mrb[1].mxu1 }
 0x162   :  { %1984 = vpow2.f32 %v482_v19  ;;  %v512_v25 = vmul.f32 1.442695, %v385_v24 }
 0x163   :  { %1986 = vpow2.f32 %v514_v22  ;;  %v1658_v26 = vpop.f32.mrb[2].mxu0 }
 0x164   :  { %1988 = vpow2.f32 %v480_v23  ;;  %v486_v27 = vmul.f32 1.442695, %v1658_v26  ;;  %v1714_v28 = vpop.f32.mrb[2].mxu1  ;;  %v250_v29 = vpop.f32.mrb[3].mxu0 }
 0x165   :  { %1990 = vpow2.f32 %v512_v25  ;;  %v518_v30 = vmul.f32 1.442695, %v1714_v28  ;;  %v484_v31 = vmul.f32 1.442695, %v250_v29  ;;  %v395_v32 = vpop.f32.mrb[3].mxu1 }
 0x166   :  { %1992 = vpow2.f32 %v486_v27  ;;  %v516_v33 = vmul.f32 1.442695, %v395_v32 }
 0x167   :  { %1994 = vpow2.f32 %v518_v30  ;;  %v1661_v34 = vpop.f32.mrb[4].mxu0 }
 0x168   :  { %1996 = vpow2.f32 %v484_v31  ;;  %v490_v35 = vmul.f32 1.442695, %v1661_v34  ;;  %v1717_v36 = vpop.f32.mrb[4].mxu1  ;;  %v260_v37 = vpop.f32.mrb[5].mxu0 }
 0x169   :  { %1998 = vpow2.f32 %v516_v33  ;;  %v522_v38 = vmul.f32 1.442695, %v1717_v36  ;;  %v488_v39 = vmul.f32 1.442695, %v260_v37  ;;  %v405_v40 = vpop.f32.mrb[5].mxu1 }
 0x16a   :  { %2000 = vpow2.f32 %v490_v35  ;;  %v520_v41 = vmul.f32 1.442695, %v405_v40 }
 0x16b   :  { %2002 = vpow2.f32 %v522_v38  ;;  %v1664_v42 = vpop.f32.mrb[6].mxu0 }
 0x16c   :  { %v1985_v43 = vpop.eup %1984  ;;  %2004 = vpow2.f32 %v488_v39  ;;  %v494_v44 = vmul.f32 1.442695, %v1664_v42  ;;  %v1720_v45 = vpop.f32.mrb[6].mxu1 }
 0x16d   :  { %v270_v46 = vpop.f32.mrb[7].mxu0  ;;  %v1987_v47 = vpop.eup %1986  ;;  %2006 = vpow2.f32 %v520_v41  ;;  %v526_v48 = vmul.f32 1.442695, %v1720_v45 }
 0x16e   :  { %v492_v49 = vmul.f32 1.442695, %v270_v46  ;;  %v415_v50 = vpop.f32.mrb[7].mxu1  ;;  %v1989_v51 = vpop.eup %1988  ;;  %v545_v52 = vadd.f32 %v1987_v47, %v1985_v43  ;;  %2008 = vpow2.f32 %v494_v44 }
 0x16f   :  { %v524_v53 = vmul.f32 1.442695, %v415_v50  ;;  %v1991_v54 = vpop.eup %1990  ;;  %2010 = vpow2.f32 %v526_v48  ;;  %v1667_v55 = vpop.f32.mrb[8].mxu0 }
 0x170   :  { %v1993_v56 = vpop.eup %1992  ;;  %562 = vadd.xlane.f32.xlu1 %v545_v52  ;;  %v544_v57 = vadd.f32 %v1991_v54, %v1989_v51  ;;  %2012 = vpow2.f32 %v492_v49  ;;  %v498_v58 = vmul.f32 1.442695, %v1667_v55  ;;  %v1723_v59 = vpop.f32.mrb[8].mxu1 }
 0x171   :  { %v280_v60 = vpop.f32.mrb[9].mxu0  ;;  %v1995_v61 = vpop.eup %1994  ;;  %2014 = vpow2.f32 %v524_v53  ;;  %v530_v62 = vmul.f32 1.442695, %v1723_v59 }
 0x172   :  { %v496_v63 = vmul.f32 1.442695, %v280_v60  ;;  %v425_v0 = vpop.f32.mrb[9].mxu1  ;;  %v1997_v1 = vpop.eup %1996  ;;  %560 = vadd.xlane.f32.xlu0 %v544_v57  ;;  %2016 = vpow2.f32 %v498_v58  ;;  %v547_v3 = vadd.f32 %v1995_v61, %v1993_v56 }
 0x173   :  { %v528_v2 = vmul.f32 1.442695, %v425_v0  ;;  %v1999_v4 = vpop.eup %1998  ;;  %2018 = vpow2.f32 %v530_v62  ;;  %v1670_v5 = vpop.f32.mrb[10].mxu0 }
 0x174   :  { %v2001_v6 = vpop.eup %2000  ;;  %2020 = vpow2.f32 %v496_v63  ;;  %v502_v7 = vmul.f32 1.442695, %v1670_v5  ;;  %v1726_v8 = vpop.f32.mrb[10].mxu1  ;;  %566 = vadd.xlane.f32.xlu1 %v547_v3  ;;  %v2475_v10 = vadd.f32 %v1999_v4, %v1997_v1 }
 0x175   :  { %v290_v9 = vpop.f32.mrb[11].mxu0  ;;  %v2003_v11 = vpop.eup %2002  ;;  %2022 = vpow2.f32 %v528_v2  ;;  %v534_v12 = vmul.f32 1.442695, %v1726_v8 }
 0x176   :  { %v435_v13 = vpop.f32.mrb[11].mxu1  ;;  %v500_v14 = vmul.f32 1.442695, %v290_v9  ;;  %v2005_v15 = vpop.eup %2004  ;;  %2024 = vpow2.f32 %v502_v7  ;;  %v549_v17 = vadd.f32 %v2003_v11, %v2001_v6 }
 0x177   :  { %v532_v16 = vmul.f32 1.442695, %v435_v13  ;;  %v2007_v18 = vpop.eup %2006  ;;  %2026 = vpow2.f32 %v534_v12  ;;  %v1673_v19 = vpop.f32.mrb[12].mxu0 }
 0x178   :  { %v2009_v20 = vpop.eup %2008  ;;  %v506_v21 = vmul.f32 1.442695, %v1673_v19  ;;  %v1729_v22 = vpop.f32.mrb[12].mxu1  ;;  %570 = vadd.xlane.f32.xlu1 %v549_v17  ;;  %v2477_v24 = vadd.f32 %v2007_v18, %v2005_v15 }
 0x179   :  { %2028 = vpow2.f32 %v532_v16  ;;  %v300_v23 = vpop.f32.mrb[13].mxu0  ;;  %v2011_v25 = vpop.eup %2010  ;;  %v538_v26 = vmul.f32 1.442695, %v1729_v22 }
 0x17a   :  { %2030 = vpow2.f32 %v500_v14  ;;  %v445_v27 = vpop.f32.mrb[13].mxu1  ;;  %v504_v28 = vmul.f32 1.442695, %v300_v23  ;;  %v2013_v29 = vpop.eup %2012  ;;  %v551_v31 = vadd.f32 %v2011_v25, %v2009_v20 }
 0x17b   :  { %2032 = vpow2.f32 %v506_v21  ;;  %v536_v30 = vmul.f32 1.442695, %v445_v27  ;;  %v2015_v32 = vpop.eup %2014  ;;  %v1676_v33 = vpop.f32.mrb[14].mxu0 }
 0x17c   :  { %2034 = vpow2.f32 %v538_v26  ;;  %v2017_v34 = vpop.eup %2016  ;;  %v510_v35 = vmul.f32 1.442695, %v1676_v33  ;;  %v1732_v36 = vpop.f32.mrb[14].mxu1  ;;  %574 = vadd.xlane.f32.xlu1 %v551_v31  ;;  %v2479_v38 = vadd.f32 %v2015_v32, %v2013_v29 }
 0x17d   :  { %2036 = vpow2.f32 %v536_v30  ;;  %v310_v37 = vpop.f32.mrb[15].mxu0  ;;  %v2019_v39 = vpop.eup %2018  ;;  %v542_v40 = vmul.f32 1.442695, %v1732_v36 }
 0x17e   :  { %2038 = vpow2.f32 %v504_v28  ;;  %v455_v41 = vpop.f32.mrb[15].mxu1  ;;  %v508_v42 = vmul.f32 1.442695, %v310_v37  ;;  %v2021_v43 = vpop.eup %2020  ;;  %v553_v45 = vadd.f32 %v2019_v39, %v2017_v34 }
 0x17f   :  { %2040 = vpow2.f32 %v510_v35  ;;  %v540_v44 = vmul.f32 1.442695, %v455_v41  ;;  %v2023_v46 = vpop.eup %2022 }
 0x180   :  { %2042 = vpow2.f32 %v542_v40  ;;  %v2025_v47 = vpop.eup %2024  ;;  %578 = vadd.xlane.f32.xlu1 %v553_v45  ;;  %v2481_v48 = vadd.f32 %v2023_v46, %v2021_v43 }
 0x181   :  { %2044 = vpow2.f32 %v540_v44  ;;  %v2027_v49 = vpop.eup %2026 }
 0x182   :  { %2046 = vpow2.f32 %v508_v42  ;;  %v555_v51 = vadd.f32 %v2027_v49, %v2025_v47 }
 0x183   :  { %v2029_v50 = vpop.eup %2028 }
 0x184   :  { %v2031_v52 = vpop.eup %2030  ;;  %582 = vadd.xlane.f32.xlu1 %v555_v51 }
 0x185   :  { %v2033_v53 = vpop.eup %2032  ;;  %v2483_v54 = vadd.f32 %v2031_v52, %v2029_v50 }
 0x186   :  { %v2035_v55 = vpop.eup %2034 }
 0x187   :  { %v2037_v56 = vpop.eup %2036  ;;  %v557_v57 = vadd.f32 %v2035_v55, %v2033_v53 }
 0x188   :  { %v2039_v58 = vpop.eup %2038 }
 0x189   :  { %v2041_v59 = vpop.eup %2040  ;;  %586 = vadd.xlane.f32.xlu1 %v557_v57  ;;  %v2485_v60 = vadd.f32 %v2039_v58, %v2037_v56 }
 0x18a   :  { %v2043_v61 = vpop.eup %2042 }
 0x18b   :  { %v2045_v62 = vpop.eup %2044  ;;  %v559_v63 = vadd.f32 %v2043_v61, %v2041_v59 }
 0x18c   :  { %v2047_v0 = vpop.eup %2046 }
 0x18d   :  { %590 = vadd.xlane.f32.xlu1 %v559_v63  ;;  %v2487_v1 = vadd.f32 %v2047_v0, %v2045_v62 }
 0x19f   :  { %v1767_v2 = vpop.f32.mrb[16].mxu0 }
 0x1a0   :  { %v1823_v3 = vpop.f32.mrb[16].mxu1  ;;  %v933_v4 = vmul.f32 1.442695, %v1767_v2  ;;  %v691_v5 = vpop.f32.mrb[17].mxu0 }
 0x1a1   :  { %v965_v6 = vmul.f32 1.442695, %v1823_v3  ;;  %v931_v7 = vmul.f32 1.442695, %v691_v5  ;;  %v836_v8 = vpop.f32.mrb[17].mxu1 }
 0x1a2   :  { %2048 = vpow2.f32 %v933_v4  ;;  %v963_v9 = vmul.f32 1.442695, %v836_v8 }
 0x1a3   :  { %2050 = vpow2.f32 %v965_v6  ;;  %v1770_v11 = vpop.f32.mrb[18].mxu0 }
 0x1a4   :  { %2052 = vpow2.f32 %v931_v7  ;;  %v1826_v12 = vpop.f32.mrb[18].mxu1  ;;  %v701_v13 = vpop.f32.mrb[19].mxu0  ;;  %v937_v15 = vmul.f32 1.442695, %v1770_v11 }
 0x1a5   :  { %2054 = vpow2.f32 %v963_v9  ;;  %v846_v14 = vpop.f32.mrb[19].mxu1  ;;  %v969_v17 = vmul.f32 1.442695, %v1826_v12  ;;  %v935_v19 = vmul.f32 1.442695, %v701_v13 }
 0x1a6   :  { %v967_v22 = vmul.f32 1.442695, %v846_v14  ;;  %2056 = vpow2.f32 %v937_v15 }
 0x1a7   :  { %2058 = vpow2.f32 %v969_v17  ;;  %v1773_v26 = vpop.f32.mrb[20].mxu0 }
 0x1a8   :  { %2060 = vpow2.f32 %v935_v19  ;;  %v1829_v27 = vpop.f32.mrb[20].mxu1  ;;  %v941_v28 = vmul.f32 1.442695, %v1773_v26  ;;  %v711_v30 = vpop.f32.mrb[21].mxu0 }
 0x1a9   :  { %2062 = vpow2.f32 %v967_v22  ;;  %v973_v29 = vmul.f32 1.442695, %v1829_v27  ;;  %v856_v31 = vpop.f32.mrb[21].mxu1  ;;  %v939_v32 = vmul.f32 1.442695, %v711_v30 }
 0x1aa   :  { %v971_v33 = vmul.f32 1.442695, %v856_v31  ;;  %2064 = vpow2.f32 %v941_v28 }
 0x1ab   :  { %2066 = vpow2.f32 %v973_v29  ;;  %v1776_v34 = vpop.f32.mrb[22].mxu0 }
 0x1ac   :  { %v2049_v16 = vpop.eup %2048  ;;  %2068 = vpow2.f32 %v939_v32  ;;  %v1832_v35 = vpop.f32.mrb[22].mxu1  ;;  %v945_v37 = vmul.f32 1.442695, %v1776_v34 }
 0x1ad   :  { %v2051_v18 = vpop.eup %2050  ;;  %2070 = vpow2.f32 %v971_v33  ;;  %v977_v39 = vmul.f32 1.442695, %v1832_v35  ;;  %v721_v40 = vpop.f32.mrb[23].mxu0 }
 0x1ae   :  { %v2053_v20 = vpop.eup %2052  ;;  %v2489_v21 = vadd.f32 %v2051_v18, %v2049_v16  ;;  %v866_v41 = vpop.f32.mrb[23].mxu1  ;;  %v943_v43 = vmul.f32 1.442695, %v721_v40  ;;  %2072 = vpow2.f32 %v945_v37 }
 0x1af   :  { %v2055_v23 = vpop.eup %2054  ;;  %v975_v44 = vmul.f32 1.442695, %v866_v41  ;;  %2074 = vpow2.f32 %v977_v39 }
 0x1b0   :  { %v995_v25 = vadd.f32 %v2055_v23, %v2053_v20  ;;  %v2057_v36 = vpop.eup %2056  ;;  %v1835_v47 = vpop.f32.mrb[24].mxu1  ;;  %2076 = vpow2.f32 %v943_v43 }
 0x1b1   :  { %v2059_v42 = vpop.eup %2058  ;;  %v981_v50 = vmul.f32 1.442695, %v1835_v47  ;;  %v876_v52 = vpop.f32.mrb[25].mxu1  ;;  %2078 = vpow2.f32 %v975_v44 }
 0x1b2   :  { %1011 = vadd.xlane.f32.xlu0 %v995_v25  ;;  %v2061_v45 = vpop.eup %2060  ;;  %v979_v55 = vmul.f32 1.442695, %v876_v52  ;;  %v2494_v56 = vadd.f32 %v2059_v42, %v2057_v36 }
 0x1b3   :  { %v2063_v46 = vpop.eup %2062 }
 0x1b4   :  { %v2065_v57 = vpop.eup %2064  ;;  %v1838_v59 = vpop.f32.mrb[26].mxu1 }
 0x1b5   :  { %v2067_v61 = vpop.eup %2066  ;;  %v886_v62 = vpop.f32.mrb[27].mxu1  ;;  %v985_v2 = vmul.f32 1.442695, %v1838_v59 }
 0x1b6   :  { %564 = vadd.xlane.f32.xlu0 %v2475_v10  ;;  %v1779_v10 = vpop.f32.mrb[24].mxu0  ;;  %v2069_v0 = vpop.eup %2068  ;;  %v983_v3 = vmul.f32 1.442695, %v886_v62  ;;  %v2497_v6 = vadd.f32 %v2067_v61, %v2065_v57  ;;  %v464_v57 = vld [vmem:[#allocation2] sm:$0xff]  ;;  %v467_v61 = vld [vmem:[#allocation2 + $0x18] sm:$0xff] }
 0x1b7   :  { %v949_v49 = vmul.f32 1.442695, %v1779_v10  ;;  %v731_v51 = vpop.f32.mrb[25].mxu0  ;;  %v2071_v4 = vpop.eup %2070 }
 0x1b8   :  { %v947_v53 = vmul.f32 1.442695, %v731_v51  ;;  %v1782_v58 = vpop.f32.mrb[26].mxu0  ;;  %v1841_v8 = vpop.f32.mrb[28].mxu1  ;;  %v999_v9 = vadd.f32 %v2071_v4, %v2069_v0  ;;  %v471_v4 = vld [vmem:[#allocation2 + $0x38] sm:$0xff] }
 0x1b9   :  { %2080 = vpow2.f32 %v949_v49  ;;  %v741_v63 = vpop.f32.mrb[27].mxu0  ;;  %v2073_v11 = vpop.eup %2072  ;;  %v989_v15 = vmul.f32 1.442695, %v1841_v8 }
 0x1ba   :  { %568 = vadd.xlane.f32.xlu0 %v2477_v24  ;;  %v997_v24 = vadd.f32 %v2063_v46, %v2061_v45  ;;  %2082 = vpow2.f32 %v981_v50  ;;  %v951_v5 = vmul.f32 1.442695, %v741_v63  ;;  %v1785_v7 = vpop.f32.mrb[28].mxu0  ;;  %v896_v12 = vpop.f32.mrb[29].mxu1 }
 0x1bb   :  { %2084 = vpow2.f32 %v947_v53  ;;  %v751_v13 = vpop.f32.mrb[29].mxu0  ;;  %v2075_v14 = vpop.eup %2074  ;;  %v987_v16 = vmul.f32 1.442695, %v896_v12 }
 0x1bc   :  { %1015 = vadd.xlane.f32.xlu1 %v997_v24  ;;  %2086 = vpow2.f32 %v979_v55  ;;  %v2077_v17 = vpop.eup %2076  ;;  %v955_v18 = vmul.f32 1.442695, %v751_v13  ;;  %v1002_v19 = vadd.f32 %v2075_v14, %v2073_v11  ;;  %v1788_v22 = vpop.f32.mrb[30].mxu0  ;;  %v465_v24 = vld [vmem:[#allocation2 + $0x8] sm:$0xff]  ;;  %v475_v11 = vld [vmem:[#allocation2 + $0x58] sm:$0xff] }
 0x1bd   :  { %v2079_v20 = vpop.eup %2078  ;;  %v1844_v23 = vpop.f32.mrb[30].mxu1  ;;  %v477_v14 = vld [vmem:[#allocation2 + $0x68] sm:$0xff] }
 0x1be   :  { %572 = vadd.xlane.f32.xlu0 %v2479_v38  ;;  %v953_v38 = vmul.f32 1.442695, %v1782_v58  ;;  %v906_v26 = vpop.f32.mrb[31].mxu1  ;;  %v1001_v27 = vadd.f32 %v2079_v20, %v2077_v17  ;;  %v761_v28 = vpop.f32.mrb[31].mxu0  ;;  %v993_v30 = vmul.f32 1.442695, %v1844_v23 }
 0x1bf   :  { %v991_v31 = vmul.f32 1.442695, %v906_v26  ;;  %v959_v33 = vmul.f32 1.442695, %v761_v28  ;;  %v2505_v55 = vpop.xlane.xlu1 %1094 }
 0x1c0   :  { %2088 = vpow2.f32 %v953_v38  ;;  %1019 = vadd.xlane.f32.xlu1 %v999_v9  ;;  %v469_v38 = vld [vmem:[#allocation2 + $0x28] sm:$0xff] }
 0x1c1   :  { %2090 = vpow2.f32 %v985_v2 }
 0x1c2   :  { %576 = vadd.xlane.f32.xlu0 %v2481_v48  ;;  %2092 = vpow2.f32 %v983_v3  ;;  %v957_v48 = vmul.f32 1.442695, %v1785_v7  ;;  %v473_v7 = vld [vmem:[#allocation2 + $0x48] sm:$0xff] }
 0x1c3   :  { %2094 = vpow2.f32 %v951_v5  ;;  %v2081_v25 = vpop.eup %2080 }
 0x1c4   :  { %2096 = vpow2.f32 %v957_v48  ;;  %v2083_v29 = vpop.eup %2082  ;;  %1023 = vadd.xlane.f32.xlu1 %v1001_v27 }
 0x1c5   :  { %2098 = vpow2.f32 %v989_v15  ;;  %v2085_v32 = vpop.eup %2084  ;;  %v1004_v34 = vadd.f32 %v2083_v29, %v2081_v25  ;;  %v466_v25 = vld [vmem:[#allocation2 + $0x10] sm:$0xff]  ;;  %v468_v29 = vld [vmem:[#allocation2 + $0x20] sm:$0xff] }
 0x1c6   :  { %580 = vadd.xlane.f32.xlu0 %v2483_v54  ;;  %2100 = vpow2.f32 %v987_v16  ;;  %v961_v54 = vmul.f32 1.442695, %v1788_v22  ;;  %v2087_v35 = vpop.eup %2086  ;;  %v479_v16 = vld [vmem:[#allocation2 + $0x78] sm:$0xff] }
 0x1c7   :  { %2102 = vpow2.f32 %v955_v18  ;;  %v1003_v36 = vadd.f32 %v2087_v35, %v2085_v32  ;;  %v470_v32 = vld [vmem:[#allocation2 + $0x30] sm:$0xff] }
 0x1c8   :  { %2104 = vpow2.f32 %v961_v54 }
 0x1c9   :  { %2106 = vpow2.f32 %v993_v30  ;;  %1027 = vadd.xlane.f32.xlu1 %v1003_v36 }
 0x1ca   :  { %584 = vadd.xlane.f32.xlu0 %v2485_v60  ;;  %v2089_v37 = vpop.eup %2088  ;;  %2108 = vpow2.f32 %v991_v31 }
 0x1cb   :  { %v2091_v39 = vpop.eup %2090  ;;  %2110 = vpow2.f32 %v959_v33 }
 0x1cc   :  { %v2093_v60 = vpop.eup %2092  ;;  %v1006_v40 = vadd.f32 %v2091_v39, %v2089_v37  ;;  %v917_v39 = vld [vmem:[#allocation3 + $0x10] sm:$0xff] }
 0x1cd   :  { %v2095_v41 = vpop.eup %2094 }
 0x1ce   :  { %588 = vadd.xlane.f32.xlu0 %v2487_v1  ;;  %v2097_v42 = vpop.eup %2096  ;;  %v1005_v43 = vadd.f32 %v2095_v41, %v2093_v60  ;;  %v472_v60 = vld [vmem:[#allocation2 + $0x40] sm:$0xff] }
 0x1cf   :  { %v2099_v44 = vpop.eup %2098 }
 0x1d0   :  { %v2101_v45 = vpop.eup %2100  ;;  %1031 = vadd.xlane.f32.xlu1 %v1005_v43  ;;  %v1008_v46 = vadd.f32 %v2099_v44, %v2097_v42  ;;  %v474_v44 = vld [vmem:[#allocation2 + $0x50] sm:$0xff] }
 0x1d1   :  { %v2103_v10 = vpop.eup %2102 }
 0x1d2   :  { %1013 = vadd.xlane.f32.xlu0 %v2489_v21  ;;  %v2105_v47 = vpop.eup %2104  ;;  %v1007_v1 = vadd.f32 %v2103_v10, %v2101_v45  ;;  %v2241_v21 = vmov 0   ;;  %v919_v45 = vld [vmem:[#allocation3 + $0x20] sm:$0xff] }
 0x1d3   :  { %v2107_v49 = vpop.eup %2106  ;;  %1982 = vset.pattern.permute.xlu1 %v2241_v21  ;;  %1983 = vset.pattern.permute.xlu0 %v2241_v21 }
 0x1d4   :  { %v2109_v50 = vpop.eup %2108  ;;  %1035 = vadd.xlane.f32.xlu1 %v1007_v1  ;;  %v1010_v51 = vadd.f32 %v2107_v49, %v2105_v47 }
 0x1d5   :  { %v2111_v52 = vpop.eup %2110 }
 0x1d6   :  { %1017 = vadd.xlane.f32.xlu0 %v2494_v56  ;;  %v1009_v53 = vadd.f32 %v2111_v52, %v2109_v50  ;;  %v476_v50 = vld [vmem:[#allocation2 + $0x60] sm:$0xff] }
 0x1d8   :  { %1039 = vadd.xlane.f32.xlu1 %v1009_v53 }
 0x1da   :  { %1021 = vadd.xlane.f32.xlu0 %v2497_v6 }
 0x1de   :  { %1025 = vadd.xlane.f32.xlu0 %v1002_v19  ;;  %v915_v19 = vld [vmem:[#allocation3] sm:$0xff] }
 0x1e2   :  { %1029 = vadd.xlane.f32.xlu0 %v1004_v34 }
 0x1e6   :  { %1033 = vadd.xlane.f32.xlu0 %v1006_v40 }
 0x1ea   :  { %1037 = vadd.xlane.f32.xlu0 %v1008_v46 }
 0x1ee   :  { %1041 = vadd.xlane.f32.xlu0 %v1010_v51  ;;  %v921_v51 = vld [vmem:[#allocation3 + $0x30] sm:$0xff] }
 0x1fd   :  { %v563_v56 = vpop.xlane.xlu1 %562 }
 0x1fe   :  { %v593_v58 = vadd.f32 %v563_v56, %v465_v24 }
 0x1ff   :  { %v561_v59 = vpop.xlane.xlu0 %560 }
 0x200   :  { %610 = vst.msk [vmem:[#allocation2 + $0x8] sm:$0xff] %vm77_vm0, %v593_v58  ;;  %v592_v62 = vadd.f32 %v561_v59, %v464_v57  ;;  %v478_v57 = vld [vmem:[#allocation2 + $0x70] sm:$0xff] }
 0x201   :  { %v567_v63 = vpop.xlane.xlu1 %566 }
 0x202   :  { %609 = vst.msk [vmem:[#allocation2] sm:$0xff] %vm77_vm0, %v592_v62  ;;  %v595_v0 = vadd.f32 %v567_v63, %v467_v61  ;;  %v923_v61 = vld [vmem:[#allocation3 + $0x40] sm:$0xff] }
 0x204   :  { %612 = vst.msk [vmem:[#allocation2 + $0x18] sm:$0xff] %vm77_vm0, %v595_v0 }
 0x205   :  { %v571_v2 = vpop.xlane.xlu1 %570 }
 0x206   :  { %v597_v3 = vadd.f32 %v571_v2, %v469_v38 }
 0x208   :  { %614 = vst.msk [vmem:[#allocation2 + $0x28] sm:$0xff] %vm77_vm0, %v597_v3  ;;  %v916_v3 = vld [vmem:[#allocation3 + $0x8] sm:$0xff] }
 0x209   :  { %v575_v5 = vpop.xlane.xlu1 %574  ;;  %v1126_v22 = vld [vmem:[#allocation2] sm:$0xff] }
 0x20a   :  { %v599_v6 = vadd.f32 %v575_v5, %v471_v4  ;;  %v1461_v26 = vadd.f32 -241.64873, %v1126_v22 }
 0x20c   :  { %616 = vst.msk [vmem:[#allocation2 + $0x38] sm:$0xff] %vm77_vm0, %v599_v6  ;;  %v1158_v54 = vmax.f32 %v1461_v26, 1e-30 }
 0x20d   :  { %v579_v8 = vpop.xlane.xlu1 %578 }
 0x20e   :  { %v601_v9 = vadd.f32 %v579_v8, %v473_v7  ;;  %2112 = vlog2.f32 %v1158_v54  ;;  %v925_v8 = vld [vmem:[#allocation3 + $0x50] sm:$0xff] }
 0x210   :  { %618 = vst.msk [vmem:[#allocation2 + $0x48] sm:$0xff] %vm77_vm0, %v601_v9 }
 0x211   :  { %v583_v12 = vpop.xlane.xlu1 %582 }
 0x212   :  { %v603_v13 = vadd.f32 %v583_v12, %v475_v11  ;;  %v918_v12 = vld [vmem:[#allocation3 + $0x18] sm:$0xff] }
 0x214   :  { %620 = vst.msk [vmem:[#allocation2 + $0x58] sm:$0xff] %vm77_vm0, %v603_v13 }
 0x216   :  { %v587_v48 = vpop.xlane.xlu1 %586 }
 0x217   :  { %v605_v15 = vadd.f32 %v587_v48, %v477_v14 }
 0x218   :  { %v2113_v47 = vpop.eup %2112 }
 0x219   :  { %622 = vst.msk [vmem:[#allocation2 + $0x68] sm:$0xff] %vm77_vm0, %v605_v15  ;;  %v1175_v53 = vmul.f32 0.6931472, %v2113_v47  ;;  %v927_v15 = vld [vmem:[#allocation3 + $0x60] sm:$0xff] }
 0x21a   :  { %v591_v17 = vpop.xlane.xlu1 %590 }
 0x21b   :  { %v607_v18 = vadd.f32 %v591_v17, %v479_v16  ;;  %v1206_v63 = vsub.f32 %v1175_v53, %v2505_v55 }
 0x21d   :  { %624 = vst.msk [vmem:[#allocation2 + $0x78] sm:$0xff] %vm77_vm0, %v607_v18  ;;  %v920_v18 = vld [vmem:[#allocation3 + $0x28] sm:$0xff] }
 0x23f   :  { %v1012_v20 = vpop.xlane.xlu0 %1011 }
 0x240   :  { %v1043_v23 = vadd.f32 %v1012_v20, %v915_v19 }
 0x242   :  { %1059 = vst.msk [vmem:[#allocation3] sm:$0xff] %vm77_vm0, %v1043_v23 }
 0x243   :  { %v565_v27 = vpop.xlane.xlu0 %564 }
 0x244   :  { %v594_v28 = vadd.f32 %v565_v27, %v466_v25  ;;  %v929_v25 = vld [vmem:[#allocation3 + $0x70] sm:$0xff] }
 0x246   :  { %611 = vst.msk [vmem:[#allocation2 + $0x10] sm:$0xff] %vm77_vm0, %v594_v28  ;;  %v922_v28 = vld [vmem:[#allocation3 + $0x38] sm:$0xff] }
 0x247   :  { %v569_v30 = vpop.xlane.xlu0 %568 }
 0x248   :  { %v596_v31 = vadd.f32 %v569_v30, %v468_v29 }
 0x249   :  { %v1222_v33 = vld [vmem:[#allocation3] sm:$0xff]  ;;  %v1016_v40 = vpop.xlane.xlu1 %1015 }
 0x24a   :  { %613 = vst.msk [vmem:[#allocation2 + $0x20] sm:$0xff] %vm77_vm0, %v596_v31  ;;  %v1477_v34 = vadd.f32 -241.64873, %v1222_v33  ;;  %v1045_v42 = vadd.f32 %v1016_v40, %v917_v39  ;;  %v924_v33 = vld [vmem:[#allocation3 + $0x48] sm:$0xff] }
 0x24b   :  { %v573_v35 = vpop.xlane.xlu0 %572 }
 0x24c   :  { %v598_v36 = vadd.f32 %v573_v35, %v470_v32  ;;  %v1254_v37 = vmax.f32 %v1477_v34, 1e-30  ;;  %1061 = vst.msk [vmem:[#allocation3 + $0x10] sm:$0xff] %vm77_vm0, %v1045_v42  ;;  %v930_v42 = vld [vmem:[#allocation3 + $0x78] sm:$0xff] }
 0x24d   :  { %v1020_v10 = vpop.xlane.xlu1 %1019 }
 0x24e   :  { %615 = vst.msk [vmem:[#allocation2 + $0x30] sm:$0xff] %vm77_vm0, %v598_v36  ;;  %2114 = vlog2.f32 %v1254_v37  ;;  %v1047_v49 = vadd.f32 %v1020_v10, %v919_v45  ;;  %v926_v36 = vld [vmem:[#allocation3 + $0x58] sm:$0xff] }
 0x24f   :  { %v577_v41 = vpop.xlane.xlu0 %576 }
 0x250   :  { %v600_v43 = vadd.f32 %v577_v41, %v472_v60  ;;  %1063 = vst.msk [vmem:[#allocation3 + $0x20] sm:$0xff] %vm77_vm0, %v1047_v49  ;;  %v928_v60 = vld [vmem:[#allocation3 + $0x68] sm:$0xff] }
 0x251   :  { %v1024_v56 = vpop.xlane.xlu1 %1023 }
 0x252   :  { %617 = vst.msk [vmem:[#allocation2 + $0x40] sm:$0xff] %vm77_vm0, %v600_v43  ;;  %v1049_v59 = vadd.f32 %v1024_v56, %v921_v51 }
 0x253   :  { %v581_v46 = vpop.xlane.xlu0 %580 }
 0x254   :  { %v602_v1 = vadd.f32 %v581_v46, %v474_v44  ;;  %1065 = vst.msk [vmem:[#allocation3 + $0x30] sm:$0xff] %vm77_vm0, %v1049_v59 }
 0x256   :  { %619 = vst.msk [vmem:[#allocation2 + $0x50] sm:$0xff] %vm77_vm0, %v602_v1  ;;  %v1028_v2 = vpop.xlane.xlu1 %1027 }
 0x257   :  { %v585_v52 = vpop.xlane.xlu0 %584  ;;  %v1051_v5 = vadd.f32 %v1028_v2, %v923_v61 }
 0x258   :  { %v2115_v21 = vpop.eup %2114  ;;  %v604_v24 = vadd.f32 %v585_v52, %v476_v50 }
 0x259   :  { %v1271_v58 = vmul.f32 0.6931472, %v2115_v21  ;;  %1067 = vst.msk [vmem:[#allocation3 + $0x40] sm:$0xff] %vm77_vm0, %v1051_v5 }
 0x25a   :  { %621 = vst.msk [vmem:[#allocation2 + $0x60] sm:$0xff] %vm77_vm0, %v604_v24 }
 0x25b   :  { %v589_v62 = vpop.xlane.xlu0 %588  ;;  %v1302_v0 = vsub.f32 %v1271_v58, %v2505_v55 }
 0x25c   :  { %v606_v38 = vadd.f32 %v589_v62, %v478_v57 }
 0x25d   :  { %v1369_v4 = vadd.f32 %v1302_v0, %v1206_v63  ;;  %v1032_v13 = vpop.xlane.xlu1 %1031 }
 0x25e   :  { %623 = vst.msk [vmem:[#allocation2 + $0x70] sm:$0xff] %vm77_vm0, %v606_v38  ;;  %v1053_v14 = vadd.f32 %v1032_v13, %v925_v8 }
 0x25f   :  { %v1014_v6 = vpop.xlane.xlu0 %1013  ;;  %v1401_v7 = vsel %vm77_vm0, %v1369_v4, 0.0 }
 0x260   :  { %v1044_v9 = vadd.f32 %v1014_v6, %v916_v3  ;;  %v1432_v11 = vrot.slane %v1401_v7, 4  ;;  %1069 = vst.msk [vmem:[#allocation3 + $0x50] sm:$0xff] %vm77_vm0, %v1053_v14 }
 0x261   :  { %v1036_v19 = vpop.xlane.xlu1 %1035 }
 0x262   :  { %1060 = vst.msk [vmem:[#allocation3 + $0x8] sm:$0xff] %vm77_vm0, %v1044_v9  ;;  %v1433_v55 = vadd.f32 %v1432_v11, %v1401_v7  ;;  %v1055_v22 = vadd.f32 %v1036_v19, %v927_v15 }
 0x263   :  { %v1018_v48 = vpop.xlane.xlu0 %1017 }
 0x264   :  { %v1434_v16 = vrot.slane %v1433_v55, 2  ;;  %v1046_v17 = vadd.f32 %v1018_v48, %v918_v12  ;;  %1071 = vst.msk [vmem:[#allocation3 + $0x60] sm:$0xff] %vm77_vm0, %v1055_v22 }
 0x265   :  { %v1040_v29 = vpop.xlane.xlu1 %1039 }
 0x266   :  { %v1435_v20 = vadd.f32 %v1434_v16, %v1433_v55  ;;  %1062 = vst.msk [vmem:[#allocation3 + $0x18] sm:$0xff] %vm77_vm0, %v1046_v17  ;;  %v1057_v30 = vadd.f32 %v1040_v29, %v929_v25 }
 0x267   :  { %v1022_v23 = vpop.xlane.xlu0 %1021 }
 0x268   :  { %v1436_v26 = vrot.slane %v1435_v20, 1  ;;  %v1048_v27 = vadd.f32 %v1022_v23, %v920_v18  ;;  %1073 = vst.msk [vmem:[#allocation3 + $0x70] sm:$0xff] %vm77_vm0, %v1057_v30 }
 0x26a   :  { %v1437_v54 = vadd.f32 %v1436_v26, %v1435_v20  ;;  %1064 = vst.msk [vmem:[#allocation3 + $0x28] sm:$0xff] %vm77_vm0, %v1048_v27 }
 0x26b   :  { %v1026_v31 = vpop.xlane.xlu0 %1025 }
 0x26c   :  { %1440 = vperm.xlu1 %1982, %v1437_v54   ;;  %v1050_v32 = vadd.f32 %v1026_v31, %v922_v28 }
 0x26e   :  { %1066 = vst.msk [vmem:[#allocation3 + $0x38] sm:$0xff] %vm77_vm0, %v1050_v32 }
 0x26f   :  { %v1030_v34 = vpop.xlane.xlu0 %1029 }
 0x270   :  { %v1052_v35 = vadd.f32 %v1030_v34, %v924_v33 }
 0x272   :  { %1068 = vst.msk [vmem:[#allocation3 + $0x48] sm:$0xff] %vm77_vm0, %v1052_v35 }
 0x273   :  { %v1034_v37 = vpop.xlane.xlu0 %1033 }
 0x274   :  { %v1054_v39 = vadd.f32 %v1034_v37, %v926_v36 }
 0x276   :  { %1070 = vst.msk [vmem:[#allocation3 + $0x58] sm:$0xff] %vm77_vm0, %v1054_v39 }
 0x277   :  { %v1038_v40 = vpop.xlane.xlu0 %1037 }
 0x278   :  { %v1056_v41 = vadd.f32 %v1038_v40, %v928_v60 }
 0x27a   :  { %1072 = vst.msk [vmem:[#allocation3 + $0x68] sm:$0xff] %vm77_vm0, %v1056_v41 }
 0x27b   :  { %v1042_v43 = vpop.xlane.xlu0 %1041 }
 0x27c   :  { %v1058_v44 = vadd.f32 %v1042_v43, %v930_v42 }
 0x27e   :  { %1074 = vst.msk [vmem:[#allocation3 + $0x78] sm:$0xff] %vm77_vm0, %v1058_v44 }
 0x2eb   :  { %v1441_v45 = vpop.permute.xlu1 %1440 }
 0x2ec   :  { %1443 = vst [vmem:[#allocation12] sm:$0x1] %v1441_v45 }
 0x2ed   :  { %2215 = shalt.err (!%p2212_p8)
}
 0x2ee   :  { %s2216_s14 = scalar_lea.hbm %s2558_s4, 16 }
 0x2ef   :  { %p2217_p9 = scmp.ne.s32.totalorder %s2558_s4, %s2216_s14  ;;  %p2220_p10 = scmp.lt.u32.totalorder %s2216_s14, %s2558_s4 }
 0x2f1   :  { %p2222_p11 = pnand %p2220_p10, %p2217_p9 }
 0x2f3   :  { %2225 = shalt.err (!%p2222_p11)
}
 0x2f4   :  { %1453 = dma.vmem_to_hbm [thread:$0]  %s1451_s27, 16, %s2558_s4, [#allocation6]  }
 0x2f5   :  { %2232 = dma.done.wait [#allocation6], 16  }
 0x2f6   :  { %2233 = vsyncadd [#allocation6], 4294967280 }
 0x2f7   :  { %1457 = vsyncpa [#allocation5], 1 }
 0x2f8   :  { %1458 = vsyncpa [#allocation8], 1 }
 0x2f9   :  { %1459 = vsyncpa [#allocation11], 1 }
 0x2fa   :  { %1460 = vsyncpa [#allocation6], 1 }

</bundles_post_ra>
